<compile_context>
chip_gen: v5e
topology: v5e:2x2
jax: 0.10.0
libtpu: 0.0.40
codegen_flags: <defaults>
</compile_context>

<pallas_src>
import functools

import jax
import jax.numpy as jnp
from jax.experimental import pallas as pl
from jax.experimental.pallas import tpu as pltpu


LANE = 128          # TPU lane width; pad feature dims to multiples of this.
SUBLANE = 8         # fp32 sublane width; pad batch to multiples of this.
VMEM_BUDGET = 40 * 1024 * 1024   # conservative: fits v7x (64 MiB) with headroom
MAX_TILE_B = 1024


def single_submodel_kernel(x_ref, w0_ref, b0_ref, w1_ref, b1_ref,
                           wh_ref, bh_ref, out_ref):
    # enc[0]: Linear + ReLU
    h0 = jnp.dot(x_ref[...], w0_ref[...], preferred_element_type=jnp.float32)
    h0 = jnp.maximum(h0 + b0_ref[...], 0.0)
    # enc[1]: Linear + ReLU   (this is feats[-1])
    h1 = jnp.dot(h0, w1_ref[...], preferred_element_type=jnp.float32)
    h1 = jnp.maximum(h1 + b1_ref[...], 0.0)
    # head: Linear on feats[-1]
    logits = jnp.dot(h1, wh_ref[...], preferred_element_type=jnp.float32)
    out_ref[...] = (logits + bh_ref[...]).astype(out_ref.dtype)


def _round_up(n, m):
    return ((n + m - 1) // m) * m


def _pad2d(a, rows, cols):
    pr, pc = rows - a.shape[0], cols - a.shape[1]
    if pr == 0 and pc == 0:
        return a
    return jnp.pad(a, ((0, pr), (0, pc)))


def _pick_tile_b(B_p8, D_p, H_p, C_p):
    """Largest batch tile (multiple of 8) that fits the VMEM budget."""
    weight_bytes = 4 * (D_p * H_p + H_p * H_p + H_p * C_p + 2 * H_p + C_p)
    # per-row bytes: double-buffered x + out tiles, plus fp32 h0/h1 live values.
    per_row = 4 * (2 * D_p + 2 * C_p + 2 * H_p)
    avail = max(VMEM_BUDGET - weight_bytes, per_row * SUBLANE)
    tile = min(MAX_TILE_B, (avail // per_row) // SUBLANE * SUBLANE)
    tile = max(tile, SUBLANE)
    return min(tile, B_p8)


@functools.partial(jax.jit, static_argnames=())
def single_submodel_forward(x, params):
    """Fused forward pass of SingleSubModel (verbose=False path).

    x: [B, D_in] fp32; params are [in, out] weights and [1, out] biases.
    Returns logits [B, C] fp32.
    """
    w0, b0, w1, b1, wh, bh = params
    B, D = x.shape
    H = w0.shape[1]
    C = wh.shape[1]

    # Lane-pad feature dims to 128; sublane-pad batch, then round to the tile.
    D_p = _round_up(D, LANE)
    H_p = _round_up(H, LANE)
    C_p = _round_up(C, LANE)
    B_p8 = _round_up(B, SUBLANE)

    TILE_B = _pick_tile_b(B_p8, D_p, H_p, C_p)
    B_p = _round_up(B_p8, TILE_B)

    x_p = _pad2d(x, B_p, D_p)
    w0_p = _pad2d(w0, D_p, H_p)
    b0_p = _pad2d(b0, 1, H_p)
    w1_p = _pad2d(w1, H_p, H_p)
    b1_p = _pad2d(b1, 1, H_p)
    wh_p = _pad2d(wh, H_p, C_p)
    bh_p = _pad2d(bh, 1, C_p)

    grid = (B_p // TILE_B,)

    flops = 2 * B_p * (D_p * H_p + H_p * H_p + H_p * C_p)
    bytes_accessed = 4 * (B_p * D_p + B_p * C_p
                          + D_p * H_p + H_p * H_p + H_p * C_p
                          + 2 * H_p + C_p)

    out_p = pl.pallas_call(
        single_submodel_kernel,
        out_shape=jax.ShapeDtypeStruct((B_p, C_p), jnp.float32),
        grid=grid,
        in_specs=[
            # activations: tiled over batch, double-buffered by the pipeline
            pl.BlockSpec((TILE_B, D_p), lambda i: (i, 0)),
            # weights / biases: same block every step -> VMEM-resident, one DMA
            pl.BlockSpec((D_p, H_p), lambda i: (0, 0)),
            pl.BlockSpec((1, H_p), lambda i: (0, 0)),
            pl.BlockSpec((H_p, H_p), lambda i: (0, 0)),
            pl.BlockSpec((1, H_p), lambda i: (0, 0)),
            pl.BlockSpec((H_p, C_p), lambda i: (0, 0)),
            pl.BlockSpec((1, C_p), lambda i: (0, 0)),
        ],
        out_specs=pl.BlockSpec((TILE_B, C_p), lambda i: (i, 0)),
        compiler_params=pltpu.CompilerParams(
            dimension_semantics=("parallel",),
            vmem_limit_bytes=64 * 1024 * 1024,
        ),
        cost_estimate=pl.CostEstimate(
            flops=flops, transcendentals=0, bytes_accessed=bytes_accessed),
    )(x_p, w0_p, b0_p, w1_p, b1_p, wh_p, bh_p)

    return out_p[:B, :C]


def init_params(key, d_in, hidden, n_classes):
    """Deterministic synthetic parameter init (nn.Linear shapes, stored
    transposed as [in, out] for the kernel)."""
    ks = jax.random.split(key, 6)
    scale = 0.1
    w0 = scale * jax.random.normal(ks[0], (d_in, hidden), jnp.float32)
    b0 = scale * jax.random.normal(ks[1], (1, hidden), jnp.float32)
    w1 = scale * jax.random.normal(ks[2], (hidden, hidden), jnp.float32)
    b1 = scale * jax.random.normal(ks[3], (1, hidden), jnp.float32)
    wh = scale * jax.random.normal(ks[4], (hidden, n_classes), jnp.float32)
    bh = scale * jax.random.normal(ks[5], (1, n_classes), jnp.float32)
    return (w0, b0, w1, b1, wh, bh)


def reference_forward(x, params):
    """Pure-JAX reference mirroring the PyTorch forward (verbose=False)."""
    w0, b0, w1, b1, wh, bh = params
    feats = []
    out = x
    out = jnp.maximum(out @ w0 + b0, 0.0)   # enc[0]
    feats.append(out)
    out = jnp.maximum(out @ w1 + b1, 0.0)   # enc[1]
    feats.append(out)
    return feats[-1] @ wh + bh              # head(feats[-1])


if __name__ == "__main__":
    key = jax.random.PRNGKey(0)
    k_x, k_p = jax.random.split(key)

    batch, d_in, hidden, n_classes = 8, 32, 32, 8
    x = jax.random.normal(k_x, (batch, d_in), jnp.float32)
    params = init_params(k_p, d_in, hidden, n_classes)

    out = single_submodel_forward(x, params)
    out = jax.block_until_ready(out)

    ref = reference_forward(x, params)
    assert out.shape == (batch, n_classes)
    assert jnp.allclose(out, ref, atol=1e-5, rtol=1e-5), "mismatch vs reference"

    print("KERNEL_OK")
</pallas_src>

<mosaic_0001>
module attributes {stable_mosaic.version = 11 : i64} {
  func.func @single_submodel_kernel(%arg0: i32, %arg1: memref<8x128xf32, #tpu.memory_space<vmem>>, %arg2: memref<128x128xf32, #tpu.memory_space<vmem>>, %arg3: memref<1x128xf32, #tpu.memory_space<vmem>>, %arg4: memref<128x128xf32, #tpu.memory_space<vmem>>, %arg5: memref<1x128xf32, #tpu.memory_space<vmem>>, %arg6: memref<128x128xf32, #tpu.memory_space<vmem>>, %arg7: memref<1x128xf32, #tpu.memory_space<vmem>>, %arg8: memref<8x128xf32, #tpu.memory_space<vmem>>) attributes {dimension_semantics = [#tpu.dimension_semantics<parallel>], iteration_bounds = array<i64: 1>, scalar_prefetch = 0 : i64, scratch_operands = 0 : i64, tpu.core_type = #tpu.core_type<tc>, window_params = [{transform_indices = @transform_0, window_bounds = array<i64: 8, 128>}, {pipeline_mode = #tpu.pipeline_mode<synchronous>, transform_indices = @transform_1, window_bounds = array<i64: 128, 128>}, {pipeline_mode = #tpu.pipeline_mode<synchronous>, transform_indices = @transform_2, window_bounds = array<i64: 1, 128>}, {pipeline_mode = #tpu.pipeline_mode<synchronous>, transform_indices = @transform_3, window_bounds = array<i64: 128, 128>}, {pipeline_mode = #tpu.pipeline_mode<synchronous>, transform_indices = @transform_4, window_bounds = array<i64: 1, 128>}, {pipeline_mode = #tpu.pipeline_mode<synchronous>, transform_indices = @transform_5, window_bounds = array<i64: 128, 128>}, {pipeline_mode = #tpu.pipeline_mode<synchronous>, transform_indices = @transform_6, window_bounds = array<i64: 1, 128>}, {transform_indices = @transform_7, window_bounds = array<i64: 8, 128>}]} {
    %c0 = arith.constant 0 : index
    %c0_0 = arith.constant 0 : index
    %0 = vector.load %arg1[%c0, %c0_0] : memref<8x128xf32, #tpu.memory_space<vmem>>, vector<8x128xf32>
    %c0_1 = arith.constant 0 : index
    %c0_2 = arith.constant 0 : index
    %1 = vector.load %arg2[%c0_1, %c0_2] : memref<128x128xf32, #tpu.memory_space<vmem>>, vector<128x128xf32>
    %cst = arith.constant dense<0.000000e+00> : vector<8x128xf32>
    %2 = tpu.matmul %0, %1, %cst {dimension_numbers = #tpu.dot_dimension_numbers<[1], [0], [0], [1], [0, 0, 1, 1], [], []>} : vector<8x128xf32>, vector<128x128xf32>, vector<8x128xf32> -> vector<8x128xf32>
    %c0_3 = arith.constant 0 : index
    %c0_4 = arith.constant 0 : index
    %3 = vector.load %arg3[%c0_3, %c0_4] : memref<1x128xf32, #tpu.memory_space<vmem>>, vector<1x128xf32>
    %4 = vector.broadcast %3 : vector<1x128xf32> to vector<8x128xf32>
    %5 = arith.addf %2, %4 : vector<8x128xf32>
    %cst_5 = arith.constant 0.000000e+00 : f32
    %6 = vector.broadcast %cst_5 : f32 to vector<8x128xf32>
    %7 = arith.maximumf %5, %6 : vector<8x128xf32>
    %c0_6 = arith.constant 0 : index
    %c0_7 = arith.constant 0 : index
    %8 = vector.load %arg4[%c0_6, %c0_7] : memref<128x128xf32, #tpu.memory_space<vmem>>, vector<128x128xf32>
    %cst_8 = arith.constant dense<0.000000e+00> : vector<8x128xf32>
    %9 = tpu.matmul %7, %8, %cst_8 {dimension_numbers = #tpu.dot_dimension_numbers<[1], [0], [0], [1], [0, 0, 1, 1], [], []>} : vector<8x128xf32>, vector<128x128xf32>, vector<8x128xf32> -> vector<8x128xf32>
    %c0_9 = arith.constant 0 : index
    %c0_10 = arith.constant 0 : index
    %10 = vector.load %arg5[%c0_9, %c0_10] : memref<1x128xf32, #tpu.memory_space<vmem>>, vector<1x128xf32>
    %11 = vector.broadcast %10 : vector<1x128xf32> to vector<8x128xf32>
    %12 = arith.addf %9, %11 : vector<8x128xf32>
    %cst_11 = arith.constant 0.000000e+00 : f32
    %13 = vector.broadcast %cst_11 : f32 to vector<8x128xf32>
    %14 = arith.maximumf %12, %13 : vector<8x128xf32>
    %c0_12 = arith.constant 0 : index
    %c0_13 = arith.constant 0 : index
    %15 = vector.load %arg6[%c0_12, %c0_13] : memref<128x128xf32, #tpu.memory_space<vmem>>, vector<128x128xf32>
    %cst_14 = arith.constant dense<0.000000e+00> : vector<8x128xf32>
    %16 = tpu.matmul %14, %15, %cst_14 {dimension_numbers = #tpu.dot_dimension_numbers<[1], [0], [0], [1], [0, 0, 1, 1], [], []>} : vector<8x128xf32>, vector<128x128xf32>, vector<8x128xf32> -> vector<8x128xf32>
    %c0_15 = arith.constant 0 : index
    %c0_16 = arith.constant 0 : index
    %17 = vector.load %arg7[%c0_15, %c0_16] : memref<1x128xf32, #tpu.memory_space<vmem>>, vector<1x128xf32>
    %18 = vector.broadcast %17 : vector<1x128xf32> to vector<8x128xf32>
    %19 = arith.addf %16, %18 : vector<8x128xf32>
    %c0_17 = arith.constant 0 : index
    %c0_18 = arith.constant 0 : index
    %20 = vector.load %arg8[%c0_17, %c0_18] : memref<8x128xf32, #tpu.memory_space<vmem>>, vector<8x128xf32>
    tpu.vector_store %arg8[%c0_17, %c0_18], %19 {strides = array<i32>} : memref<8x128xf32, #tpu.memory_space<vmem>>, vector<8x128xf32>,
    return
  }
  func.func @transform_0(%arg0: i32) -> (i32, i32) {
    %c0_i32 = arith.constant 0 : i32
    %c0_i32_0 = arith.constant 0 : i32
    return %arg0, %c0_i32 : i32, i32
  }
  func.func @transform_1(%arg0: i32) -> (i32, i32) {
    %c0_i32 = arith.constant 0 : i32
    %c0_i32_0 = arith.constant 0 : i32
    %c0_i32_1 = arith.constant 0 : i32
    return %c0_i32, %c0_i32_0 : i32, i32
  }
  func.func @transform_2(%arg0: i32) -> (i32, i32) {
    %c0_i32 = arith.constant 0 : i32
    %c0_i32_0 = arith.constant 0 : i32
    %c0_i32_1 = arith.constant 0 : i32
    return %c0_i32, %c0_i32_0 : i32, i32
  }
  func.func @transform_3(%arg0: i32) -> (i32, i32) {
    %c0_i32 = arith.constant 0 : i32
    %c0_i32_0 = arith.constant 0 : i32
    %c0_i32_1 = arith.constant 0 : i32
    return %c0_i32, %c0_i32_0 : i32, i32
  }
  func.func @transform_4(%arg0: i32) -> (i32, i32) {
    %c0_i32 = arith.constant 0 : i32
    %c0_i32_0 = arith.constant 0 : i32
    %c0_i32_1 = arith.constant 0 : i32
    return %c0_i32, %c0_i32_0 : i32, i32
  }
  func.func @transform_5(%arg0: i32) -> (i32, i32) {
    %c0_i32 = arith.constant 0 : i32
    %c0_i32_0 = arith.constant 0 : i32
    %c0_i32_1 = arith.constant 0 : i32
    return %c0_i32, %c0_i32_0 : i32, i32
  }
  func.func @transform_6(%arg0: i32) -> (i32, i32) {
    %c0_i32 = arith.constant 0 : i32
    %c0_i32_0 = arith.constant 0 : i32
    %c0_i32_1 = arith.constant 0 : i32
    return %c0_i32, %c0_i32_0 : i32, i32
  }
  func.func @transform_7(%arg0: i32) -> (i32, i32) {
    %c0_i32 = arith.constant 0 : i32
    %c0_i32_0 = arith.constant 0 : i32
    return %arg0, %c0_i32 : i32, i32
  }
}

</mosaic_0001>

<bundles_post_ra>
// kernel: single_submodel_forward.1
= control target key start
LH: loop header
LB: loop body
LE: loop exit
PB: predicated region body
PF: predicated region fallthrough
CT: control target
= control target key end

     0   :  { %s397_s0 = inlined_call_operand.vmem [shape: f32[8,128], index: 0, kind: input, shape index: {}]   ;;  %s398_s1 = inlined_call_operand.vmem [shape: f32[128,128], index: 1, kind: input, shape index: {}]   ;;  %s399_s2 = inlined_call_operand.vmem [shape: f32[1,128], index: 2, kind: input, shape index: {}]   ;;  %s400_s3 = inlined_call_operand.vmem [shape: f32[128,128], index: 3, kind: input, shape index: {}]   ;;  %s401_s4 = inlined_call_operand.vmem [shape: f32[1,128], index: 4, kind: input, shape index: {}]   ;;  %s402_s5 = inlined_call_operand.vmem [shape: f32[128,128], index: 5, kind: input, shape index: {}]   ;;  %s403_s6 = inlined_call_operand.vmem [shape: f32[1,128], index: 6, kind: input, shape index: {}]   ;;  %s404_s7 = inlined_call_operand.hbm [shape: f32[8,128], index: 7, kind: output, shape index: {}]  }
   0x1   :  { %v43_v0 = vld [vmem:[%s398_s1 + $0x78] sm:$0xff]  ;;  %v42_v1 = vld [vmem:[%s398_s1 + $0x70] sm:$0xff]  ;;  %v41_v2 = vld [vmem:[%s398_s1 + $0x68] sm:$0xff] }
   0x2   :  { %48 = vmatpush.msra.mxu0 %v43_v0  ;;  %v40_v3 = vld [vmem:[%s398_s1 + $0x60] sm:$0xff]  ;;  %v84_v4 = vld [vmem:[%s400_s3 + $0x78] sm:$0xff]  ;;  %v83_v6 = vld [vmem:[%s400_s3 + $0x70] sm:$0xff] }
   0x3   :  { %v39_v5 = vld [vmem:[%s398_s1 + $0x58] sm:$0xff]  ;;  %89 = vmatpush.msra.mxu1 %v84_v4  ;;  %v82_v7 = vld [vmem:[%s400_s3 + $0x68] sm:$0xff]  ;;  %v38_v8 = vld [vmem:[%s398_s1 + $0x50] sm:$0xff] }
   0x4   :  { %49 = vmatpush.msra.mxu0 %v42_v1  ;;  %v81_v9 = vld [vmem:[%s400_s3 + $0x60] sm:$0xff]  ;;  %v37_v10 = vld [vmem:[%s398_s1 + $0x48] sm:$0xff]  ;;  %v80_v11 = vld [vmem:[%s400_s3 + $0x58] sm:$0xff] }
   0x5   :  { %90 = vmatpush.msra.mxu1 %v83_v6 }
   0x6   :  { %50 = vmatpush.msra.mxu0 %v41_v2 }
   0x7   :  { %91 = vmatpush.msra.mxu1 %v82_v7 }
   0x8   :  { %51 = vmatpush.msra.mxu0 %v40_v3 }
   0xa   :  { %52 = vmatpush.msra.mxu0 %v39_v5 }
   0xc   :  { %53 = vmatpush.msra.mxu0 %v38_v8 }
   0xd   :  { %12 = vsyncpa [#allocation3], 0  ;;  %v36_v12 = vld [vmem:[%s398_s1 + $0x40] sm:$0xff]  ;;  %92 = vmatpush.msra.mxu1 %v81_v9  ;;  %v79_v13 = vld [vmem:[%s400_s3 + $0x50] sm:$0xff]  ;;  %s197_s29 = smov [#allocation2]   ;;  %s158_s10 = sshll.u32 %s404_s7, 4  ;;  %s159_s10 = int_to_ptr.hbm [resolvable:$true] %s158_s10 }
   0xe   :  { %54 = vmatpush.msra.mxu0 %v37_v10  ;;  %v35_v14 = vld [vmem:[%s398_s1 + $0x38] sm:$0xff]  ;;  %v78_v15 = vld [vmem:[%s400_s3 + $0x48] sm:$0xff]  ;;  %v34_v16 = vld [vmem:[%s398_s1 + $0x30] sm:$0xff]  ;;  %s156_s30 = sshll.u32 %s197_s29, 4  ;;  %s157_s30 = int_to_ptr.vmem [resolvable:$true] %s156_s30 }
   0xf   :  { %93 = vmatpush.msra.mxu1 %v80_v11  ;;  %v77_v17 = vld [vmem:[%s400_s3 + $0x40] sm:$0xff]  ;;  %v33_v18 = vld [vmem:[%s398_s1 + $0x28] sm:$0xff]  ;;  %v76_v19 = vld [vmem:[%s400_s3 + $0x38] sm:$0xff] }
  0x10   :  { %55 = vmatpush.msra.mxu0 %v36_v12  ;;  %v32_v20 = vld [vmem:[%s398_s1 + $0x20] sm:$0xff]  ;;  %v75_v21 = vld [vmem:[%s400_s3 + $0x30] sm:$0xff]  ;;  %v31_v22 = vld [vmem:[%s398_s1 + $0x18] sm:$0xff] }
  0x11   :  { %94 = vmatpush.msra.mxu1 %v79_v13  ;;  %v74_v23 = vld [vmem:[%s400_s3 + $0x28] sm:$0xff]  ;;  %v30_v24 = vld [vmem:[%s398_s1 + $0x10] sm:$0xff]  ;;  %v73_v25 = vld [vmem:[%s400_s3 + $0x20] sm:$0xff] }
  0x12   :  { %56 = vmatpush.msra.mxu0 %v35_v14  ;;  %v29_v26 = vld [vmem:[%s398_s1 + $0x8] sm:$0xff]  ;;  %v72_v27 = vld [vmem:[%s400_s3 + $0x18] sm:$0xff]  ;;  %v28_v28 = vld [vmem:[%s398_s1] sm:$0xff] }
  0x13   :  { %95 = vmatpush.msra.mxu1 %v78_v15  ;;  %v27_v29 = vld [vmem:[%s397_s0] sm:$0xff]  ;;  %v71_v30 = vld [vmem:[%s400_s3 + $0x10] sm:$0xff]  ;;  %v70_v31 = vld [vmem:[%s400_s3 + $0x8] sm:$0xff] }
  0x14   :  { %57 = vmatpush.msra.mxu0 %v34_v16  ;;  %v69_v32 = vld [vmem:[%s400_s3] sm:$0xff]  ;;  %v125_v33 = vld [vmem:[%s402_s5 + $0x78] sm:$0xff]  ;;  %v124_v34 = vld [vmem:[%s402_s5 + $0x70] sm:$0xff] }
  0x15   :  { %96 = vmatpush.msra.mxu1 %v77_v17  ;;  %130 = vmatpush.msra.mxu2 %v125_v33  ;;  %v123_v35 = vld [vmem:[%s402_s5 + $0x68] sm:$0xff]  ;;  %v122_v36 = vld [vmem:[%s402_s5 + $0x60] sm:$0xff]  ;;  %v121_v37 = vld [vmem:[%s402_s5 + $0x58] sm:$0xff] }
  0x16   :  { %58 = vmatpush.msra.mxu0 %v33_v18  ;;  %v120_v38 = vld [vmem:[%s402_s5 + $0x50] sm:$0xff]  ;;  %v119_v39 = vld [vmem:[%s402_s5 + $0x48] sm:$0xff]  ;;  %v118_v40 = vld [vmem:[%s402_s5 + $0x40] sm:$0xff] }
  0x17   :  { %97 = vmatpush.msra.mxu1 %v76_v19  ;;  %131 = vmatpush.msra.mxu2 %v124_v34  ;;  %v117_v41 = vld [vmem:[%s402_s5 + $0x38] sm:$0xff]  ;;  %v116_v42 = vld [vmem:[%s402_s5 + $0x30] sm:$0xff]  ;;  %v115_v43 = vld [vmem:[%s402_s5 + $0x28] sm:$0xff] }
  0x18   :  { %59 = vmatpush.msra.mxu0 %v32_v20  ;;  %v114_v44 = vld [vmem:[%s402_s5 + $0x20] sm:$0xff]  ;;  %v113_v45 = vld [vmem:[%s402_s5 + $0x18] sm:$0xff]  ;;  %v112_v50 = vld [vmem:[%s402_s5 + $0x10] sm:$0xff] }
  0x19   :  { %98 = vmatpush.msra.mxu1 %v75_v21  ;;  %132 = vmatpush.msra.mxu2 %v123_v35  ;;  %v168_v46 = vld [vmem:[%s399_s2] ss:$0 sm:$0xff]  ;;  %v111_v51 = vld [vmem:[%s402_s5 + $0x8] sm:$0xff] }
  0x1a   :  { %60 = vmatpush.msra.mxu0 %v31_v22  ;;  %v110_v52 = vld [vmem:[%s402_s5] sm:$0xff] }
  0x1b   :  { %99 = vmatpush.msra.mxu1 %v74_v23  ;;  %133 = vmatpush.msra.mxu2 %v122_v36  ;;  %v169_v53 = vld [vmem:[%s401_s4] ss:$0 sm:$0xff] }
  0x1c   :  { %61 = vmatpush.msra.mxu0 %v30_v24  ;;  %v170_v57 = vld [vmem:[%s403_s6] ss:$0 sm:$0xff] }
  0x1d   :  { %100 = vmatpush.msra.mxu1 %v73_v25  ;;  %134 = vmatpush.msra.mxu2 %v121_v37 }
  0x1e   :  { %62 = vmatpush.msra.mxu0 %v29_v26 }
  0x1f   :  { %101 = vmatpush.msra.mxu1 %v72_v27  ;;  %135 = vmatpush.msra.mxu2 %v120_v38 }
  0x20   :  { %63 = vmatpush.msra.mxu0 %v28_v28 }
  0x21   :  { %64 = vmatmul.f32.vlgmr.msra.gmra.mxu0 %v27_v29  ;;  %102 = vmatpush.msra.mxu1 %v71_v30 }
  0x22   :  { %136 = vmatpush.msra.mxu2 %v119_v39 }
  0x23   :  { %103 = vmatpush.msra.mxu1 %v70_v31 }
  0x24   :  { %137 = vmatpush.msra.mxu2 %v118_v40 }
  0x25   :  { %104 = vmatpush.msra.mxu1 %v69_v32 }
  0x26   :  { %138 = vmatpush.msra.mxu2 %v117_v41 }
  0x28   :  { %139 = vmatpush.msra.mxu2 %v116_v42 }
  0x2a   :  { %140 = vmatpush.msra.mxu2 %v115_v43 }
  0x2c   :  { %141 = vmatpush.msra.mxu2 %v114_v44 }
  0x2e   :  { %142 = vmatpush.msra.mxu2 %v113_v45 }
  0x30   :  { %143 = vmatpush.msra.mxu2 %v112_v50 }
  0x32   :  { %144 = vmatpush.msra.mxu2 %v111_v51 }
  0x34   :  { %145 = vmatpush.msra.mxu2 %v110_v52 }
  0x9e   :  { %v65_v47 = vpop.f32.mrf.mxu0 }
  0x9f   :  { %v66_v48 = vadd.f32 %v168_v46, %v65_v47 }
  0xa1   :  { %v68_v49 = vmax.f32 %v66_v48, 0.0 }
  0xa3   :  { %105 = vmatmul.f32.vlgmr.msra.gmra.mxu1 %v68_v49 }
 0x120   :  { %v106_v54 = vpop.f32.mrf.mxu1 }
 0x121   :  { %v107_v55 = vadd.f32 %v169_v53, %v106_v54 }
 0x123   :  { %v109_v56 = vmax.f32 %v107_v55, 0.0 }
 0x125   :  { %146 = vmatmul.f32.vlgmr.msra.gmra.mxu2 %v109_v56 }
 0x1a8   :  { %v147_v58 = vpop.f32.mrf.mxu2 }
 0x1a9   :  { %v148_v59 = vadd.f32 %v170_v57, %v147_v58 }
 0x1ab   :  { %150 = vst [vmem:[#allocation2] sm:$0xff] %v148_v59 }
 0x1ac   :  { %161 = dma.vmem_to_hbm [thread:$0]  %s157_s30, 128, %s159_s10, [#allocation3]  }
 0x1ad   :  { %195 = dma.done.wait [#allocation3], 128  }
 0x1ae   :  { %196 = vsyncadd [#allocation3], 4294967168 }
 0x1af   :  { %166 = vsyncpa [#allocation3], 1 }

</bundles_post_ra>
